<compile_context>
chip_gen: v5e
topology: v5e:2x2
jax: 0.10.0
libtpu: 0.0.40
codegen_flags: <defaults>
</compile_context>

<pallas_src>
import functools

import jax
import jax.numpy as jnp
from jax.experimental import pallas as pl
from jax.experimental.pallas import tpu as pltpu

_MiB = 1024 * 1024


def channel_attn_kernel(x_ref, w1_ref, b1_ref, w2_ref, b2_ref, o_ref, acc_ref,
                        *, inv_hw, hw_total, needs_mask):
    # x_ref:  (1, C, t_hw)   native dtype (f32 / bf16)
    # w1_ref: (C, Cmid)      conv1 weight, pre-transposed for right-matmul
    # b1_ref: (1, Cmid)
    # w2_ref: (Cmid, C)      conv2 weight, pre-transposed
    # b2_ref: (1, C)
    # o_ref:  (1, 1, C)      sigmoid gate (x dtype)
    # acc_ref:(1, C, t_hw)   f32 full-width running sum (VPU add each step;
    #                        the single cross-lane reduce is finalize-only)
    hw = pl.program_id(1)
    t_hw = acc_ref.shape[-1]

    @pl.when(hw == 0)
    def _():
        acc_ref[...] = jnp.zeros_like(acc_ref)

    xt = x_ref[...].astype(jnp.float32)                     # (1, C, t_hw)
    if needs_mask:
        # Ragged tail: lanes past the true H*W extent hold unspecified values
        # from the padded edge block -> zero them before accumulating.
        pos = hw * t_hw + jax.lax.broadcasted_iota(jnp.int32, xt.shape, 2)
        xt = jnp.where(pos < hw_total, xt, 0.0)
    acc_ref[...] += xt                                       # pure VALU, hides under DMA

    @pl.when(hw == pl.num_programs(1) - 1)
    def _():
        # One cross-lane reduce -> global average pool for this batch row.
        pooled = jnp.sum(acc_ref[...], axis=-1) * inv_hw     # (1, C) f32

        # conv1 (1x1) == pooled @ W1^T + b1 ; ReLU
        h = jnp.dot(pooled, w1_ref[...], preferred_element_type=jnp.float32)
        h = jnp.maximum(h + b1_ref[...], 0.0)

        # conv2 (1x1) == h @ W2^T + b2 ; sigmoid
        y = jnp.dot(h, w2_ref[...], preferred_element_type=jnp.float32)
        y = y + b2_ref[...]
        o_ref[...] = jax.nn.sigmoid(y).astype(o_ref.dtype).reshape(o_ref.shape)


def _physical_vmem_bytes():
    try:
        return int(pltpu.get_tpu_info().vmem_capacity_bytes)
    except Exception:
        return 128 * _MiB          # v5e / v6e default


def _vmem_plan(phys_vmem_bytes):
    """(streaming-plan budget, scoped-VMEM limit) by TPU generation."""
    if phys_vmem_bytes <= 64 * _MiB:           # v7x: 64 MiB VMEM, ~3.2 TB/s HBM
        return 24 * _MiB, 48 * _MiB
    return 48 * _MiB, 96 * _MiB                # v5e / v6e: 128 MiB VMEM


def _pick_hw_tile(HW, C, itemsize, plan_bytes):
    """Largest lane-aligned spatial tile whose plan (2x double-buffered native
    x tile + f32 full-width accumulator) fits plan_bytes.
    Returns (tile, needs_mask)."""
    per_elem = 2 * C * itemsize + 4 * C        # bytes per spatial tile element
    t_max = max(128, (plan_bytes // per_elem) // 128 * 128)
    if HW <= t_max:
        return HW, False                       # whole row in one block, no mask
    # Prefer a mask-free multiple-of-128 divisor if it is not much smaller
    # than the budget-limited tile; otherwise use masked cdiv tiling.
    if HW % 128 == 0:
        t = t_max
        while t >= 128:
            if HW % t == 0:
                if t >= t_max // 2:
                    return t, False
                break
            t -= 128
    return t_max, True


def channel_attn(x_nchw, w1, b1, w2, b2, *, hw_tile=None):
    """x_nchw: (B, C, H, W); w1: (Cmid, C, 1, 1); b1: (Cmid,);
    w2: (C, Cmid, 1, 1); b2: (C,). Returns the sigmoid gate, shape (B, C, 1, 1),
    in x's dtype (matching the PyTorch module)."""
    B, C, H, W = x_nchw.shape
    Cmid = w1.shape[0]
    HW = H * W

    # Keep x in its native dtype (no wrapper upcast -> no extra HBM copy).
    x_flat = x_nchw.reshape(B, C, HW)
    w1_t = w1.reshape(Cmid, C).T.astype(jnp.float32)   # (C, Cmid)
    w2_t = w2.reshape(C, Cmid).T.astype(jnp.float32)   # (Cmid, C)
    b1_r = b1.reshape(1, Cmid).astype(jnp.float32)
    b2_r = b2.reshape(1, C).astype(jnp.float32)

    itemsize = x_flat.dtype.itemsize
    plan_bytes, vmem_cap = _vmem_plan(_physical_vmem_bytes())

    if hw_tile is None:
        hw_tile, needs_mask = _pick_hw_tile(HW, C, itemsize, plan_bytes)
    else:
        assert hw_tile == HW or hw_tile % 128 == 0, (
            "hw_tile must be a multiple of 128 or the full H*W extent")
        needs_mask = (HW % hw_tile != 0)
    n_hw = pl.cdiv(HW, hw_tile)

    # Scoped-VMEM limit: actual plan + headroom, never above the per-gen cap.
    tile_bytes = C * hw_tile * itemsize
    acc_bytes = C * hw_tile * 4
    needed = 2 * tile_bytes + acc_bytes + 8 * _MiB
    vmem_limit = int(min(vmem_cap, max(32 * _MiB, needed)))

    # Small tiles expose per-step DMA issue latency with 2 buffers -> go 3-deep.
    x_block = (1, C, hw_tile)
    x_index = lambda b, k: (b, 0, k)
    if tile_bytes < 2 * _MiB and n_hw > 2:
        try:
            x_spec = pl.BlockSpec(x_block, x_index, pipeline_mode=pl.Buffered(3))
        except TypeError:  # older Pallas without pipeline_mode kwarg
            x_spec = pl.BlockSpec(x_block, x_index)
    else:
        x_spec = pl.BlockSpec(x_block, x_index)

    kernel = functools.partial(channel_attn_kernel,
                               inv_hw=1.0 / float(HW),
                               hw_total=HW,
                               needs_mask=needs_mask)
    vmem_whole = pl.BlockSpec(memory_space=pltpu.MemorySpace.VMEM)

    out = pl.pallas_call(
        kernel,
        out_shape=jax.ShapeDtypeStruct((B, 1, C), x_flat.dtype),
        grid_spec=pltpu.PrefetchScalarGridSpec(
            num_scalar_prefetch=0,
            grid=(B, n_hw),
            in_specs=[
                x_spec,       # x: one batch row, full C, lane-aligned spatial tile
                vmem_whole,   # w1_t  (tiny, resident)
                vmem_whole,   # b1_r
                vmem_whole,   # w2_t
                vmem_whole,   # b2_r
            ],
            # Output block revisited across the trailing (arbitrary) HW axis;
            # written only at the last HW step.
            out_specs=pl.BlockSpec((1, 1, C), lambda b, k: (b, 0, 0)),
            scratch_shapes=[pltpu.VMEM((1, C, hw_tile), jnp.float32)],
        ),
        compiler_params=pltpu.CompilerParams(
            dimension_semantics=("parallel", "arbitrary"),
            vmem_limit_bytes=vmem_limit,
        ),
    )(x_flat, w1_t, b1_r, w2_t, b2_r)

    # TODO(synk): if the caller applies the usual SE gate x * sigmoid(attn),
    # fuse that elementwise multiply as a second streaming phase here so XLA
    # does not re-read x (largest end-to-end HBM lever for an SE block).
    return out.reshape(B, C, 1, 1)


def _ref_forward(x_nchw, w1, b1, w2, b2):
    """Pure-JAX reference mirroring the PyTorch forward."""
    B, C, H, W = x_nchw.shape
    Cmid = w1.shape[0]
    pooled = jnp.mean(x_nchw.astype(jnp.float32), axis=(2, 3))      # (B, C)
    h = jnp.maximum(pooled @ w1.reshape(Cmid, C).T + b1, 0.0)       # (B, Cmid)
    y = h @ w2.reshape(C, Cmid).T + b2                              # (B, C)
    return jax.nn.sigmoid(y).reshape(B, C, 1, 1)


if __name__ == "__main__":
    # Shapes consistent with the module: in_channels divisible by the default
    # reduction_rate=16 -> C=32, Cmid=2.
    B, C = 2, 32
    reduction_rate = 16
    Cmid = C // reduction_rate

    key = jax.random.PRNGKey(0)
    kx, k1, k2, k3, k4, kx2 = jax.random.split(key, 6)

    w1 = jax.random.normal(k1, (Cmid, C, 1, 1), dtype=jnp.float32) * 0.1
    b1 = jax.random.normal(k2, (Cmid,), dtype=jnp.float32) * 0.1
    w2 = jax.random.normal(k3, (C, Cmid, 1, 1), dtype=jnp.float32) * 0.1
    b2 = jax.random.normal(k4, (C,), dtype=jnp.float32) * 0.1

    # 1) Default auto tile (single-block path), HW = 16*16 = 256.
    x = jax.random.normal(kx, (B, C, 16, 16), dtype=jnp.float32)
    ref = _ref_forward(x, w1, b1, w2, b2)
    out = channel_attn(x, w1, b1, w2, b2)
    jax.block_until_ready(out)
    assert out.shape == (B, C, 1, 1)
    assert jnp.allclose(out, ref, atol=1e-5, rtol=1e-5)

    # 2) Forced 128-lane tile -> multi-step (even-divisor) grid reduction path.
    out = channel_attn(x, w1, b1, w2, b2, hw_tile=128)
    jax.block_until_ready(out)
    assert jnp.allclose(out, ref, atol=1e-5, rtol=1e-5)

    # 3) Ragged spatial extent (HW = 16*15 = 240, not a multiple of 128) with a
    #    forced 128-lane tile -> masked-tail reduction path.
    x2 = jax.random.normal(kx2, (B, C, 16, 15), dtype=jnp.float32)
    ref2 = _ref_forward(x2, w1, b1, w2, b2)
    out2 = channel_attn(x2, w1, b1, w2, b2, hw_tile=128)
    jax.block_until_ready(out2)
    assert jnp.allclose(out2, ref2, atol=1e-5, rtol=1e-5)

    print("KERNEL_OK")
</pallas_src>

<mosaic_0001>
module attributes {stable_mosaic.version = 11 : i64} {
  func.func @channel_attn_kernel(%arg0: i32, %arg1: i32, %arg2: memref<1x32x256xf32, #tpu.memory_space<vmem>>, %arg3: memref<32x2xf32, #tpu.memory_space<vmem>>, %arg4: memref<1x2xf32, #tpu.memory_space<vmem>>, %arg5: memref<2x32xf32, #tpu.memory_space<vmem>>, %arg6: memref<1x32xf32, #tpu.memory_space<vmem>>, %arg7: memref<1x1x32xf32, #tpu.memory_space<vmem>>, %arg8: memref<1x32x256xf32, #tpu.memory_space<vmem>>) attributes {dimension_semantics = [#tpu.dimension_semantics<parallel>, #tpu.dimension_semantics<arbitrary>], iteration_bounds = array<i64: 2, 1>, scalar_prefetch = 0 : i64, scratch_operands = 1 : i64, tpu.core_type = #tpu.core_type<tc>, window_params = [{transform_indices = @transform_0, window_bounds = array<i64: 1, 32, 256>}, {pipeline_mode = #tpu.pipeline_mode<synchronous>, transform_indices = @transform_1, window_bounds = array<i64: 32, 2>}, {pipeline_mode = #tpu.pipeline_mode<synchronous>, transform_indices = @transform_2, window_bounds = array<i64: 1, 2>}, {pipeline_mode = #tpu.pipeline_mode<synchronous>, transform_indices = @transform_3, window_bounds = array<i64: 2, 32>}, {pipeline_mode = #tpu.pipeline_mode<synchronous>, transform_indices = @transform_4, window_bounds = array<i64: 1, 32>}, {transform_indices = @transform_5, window_bounds = array<i64: 1, 1, 32>}]} {
    %c0_i32 = arith.constant 0 : i32
    %0 = arith.cmpi eq, %arg1, %c0_i32 : i32
    %1 = arith.extui %0 : i1 to i32
    %c0_i32_0 = arith.constant 0 : i32
    %2 = arith.cmpi ne, %1, %c0_i32_0 : i32
    scf.if %2 {
      %cst = arith.constant 0.000000e+00 : f32
      %10 = vector.broadcast %cst : f32 to vector<1x32x256xf32>
      %c0_11 = arith.constant 0 : index
      %c0_12 = arith.constant 0 : index
      %c0_13 = arith.constant 0 : index
      %11 = vector.load %arg8[%c0_11, %c0_12, %c0_13] : memref<1x32x256xf32, #tpu.memory_space<vmem>>, vector<1x32x256xf32>
      tpu.vector_store %arg8[%c0_11, %c0_12, %c0_13], %10 {strides = array<i32>} : memref<1x32x256xf32, #tpu.memory_space<vmem>>, vector<1x32x256xf32>,
    } else {
    }
    %c0 = arith.constant 0 : index
    %c0_1 = arith.constant 0 : index
    %c0_2 = arith.constant 0 : index
    %3 = vector.load %arg2[%c0, %c0_1, %c0_2] : memref<1x32x256xf32, #tpu.memory_space<vmem>>, vector<1x32x256xf32>
    %c0_3 = arith.constant 0 : index
    %c0_4 = arith.constant 0 : index
    %c0_5 = arith.constant 0 : index
    %4 = vector.load %arg8[%c0_3, %c0_4, %c0_5] : memref<1x32x256xf32, #tpu.memory_space<vmem>>, vector<1x32x256xf32>
    %5 = arith.addf %4, %3 : vector<1x32x256xf32>
    %c0_6 = arith.constant 0 : index
    %c0_7 = arith.constant 0 : index
    %c0_8 = arith.constant 0 : index
    %6 = vector.load %arg8[%c0_6, %c0_7, %c0_8] : memref<1x32x256xf32, #tpu.memory_space<vmem>>, vector<1x32x256xf32>
    tpu.vector_store %arg8[%c0_6, %c0_7, %c0_8], %5 {strides = array<i32>} : memref<1x32x256xf32, #tpu.memory_space<vmem>>, vector<1x32x256xf32>,
    %c0_i32_9 = arith.constant 0 : i32
    %7 = arith.cmpi eq, %arg1, %c0_i32_9 : i32
    %8 = arith.extui %7 : i1 to i32
    %c0_i32_10 = arith.constant 0 : i32
    %9 = arith.cmpi ne, %8, %c0_i32_10 : i32
    scf.if %9 {
      %c0_11 = arith.constant 0 : index
      %c0_12 = arith.constant 0 : index
      %c0_13 = arith.constant 0 : index
      %10 = vector.load %arg8[%c0_11, %c0_12, %c0_13] : memref<1x32x256xf32, #tpu.memory_space<vmem>>, vector<1x32x256xf32>
      %cst = arith.constant dense<0.000000e+00> : vector<1x32xf32>
      %11 = vector.multi_reduction <add>, %10, %cst [2] : vector<1x32x256xf32> to vector<1x32xf32>
      %cst_14 = arith.constant 3.906250e-03 : f32
      %12 = vector.broadcast %cst_14 : f32 to vector<1x32xf32>
      %13 = arith.mulf %11, %12 : vector<1x32xf32>
      %c0_15 = arith.constant 0 : index
      %c0_16 = arith.constant 0 : index
      %14 = vector.load %arg3[%c0_15, %c0_16] : memref<32x2xf32, #tpu.memory_space<vmem>>, vector<32x2xf32>
      %cst_17 = arith.constant dense<0.000000e+00> : vector<1x2xf32>
      %15 = tpu.matmul %13, %14, %cst_17 {dimension_numbers = #tpu.dot_dimension_numbers<[1], [0], [0], [1], [0, 0, 1, 1], [], []>} : vector<1x32xf32>, vector<32x2xf32>, vector<1x2xf32> -> vector<1x2xf32>
      %c0_18 = arith.constant 0 : index
      %c0_19 = arith.constant 0 : index
      %16 = vector.load %arg4[%c0_18, %c0_19] : memref<1x2xf32, #tpu.memory_space<vmem>>, vector<1x2xf32>
      %17 = arith.addf %15, %16 : vector<1x2xf32>
      %cst_20 = arith.constant 0.000000e+00 : f32
      %18 = vector.broadcast %cst_20 : f32 to vector<1x2xf32>
      %19 = arith.maximumf %17, %18 : vector<1x2xf32>
      %c0_21 = arith.constant 0 : index
      %c0_22 = arith.constant 0 : index
      %20 = vector.load %arg5[%c0_21, %c0_22] : memref<2x32xf32, #tpu.memory_space<vmem>>, vector<2x32xf32>
      %cst_23 = arith.constant dense<0.000000e+00> : vector<1x32xf32>
      %21 = tpu.matmul %19, %20, %cst_23 {dimension_numbers = #tpu.dot_dimension_numbers<[1], [0], [0], [1], [0, 0, 1, 1], [], []>} : vector<1x2xf32>, vector<2x32xf32>, vector<1x32xf32> -> vector<1x32xf32>
      %c0_24 = arith.constant 0 : index
      %c0_25 = arith.constant 0 : index
      %22 = vector.load %arg6[%c0_24, %c0_25] : memref<1x32xf32, #tpu.memory_space<vmem>>, vector<1x32xf32>
      %23 = arith.addf %21, %22 : vector<1x32xf32>
      %24 = arith.negf %23 : vector<1x32xf32>
      %25 = math.exp %24 : vector<1x32xf32>
      %cst_26 = arith.constant 1.000000e+00 : f32
      %26 = vector.broadcast %cst_26 : f32 to vector<1x32xf32>
      %27 = arith.addf %26, %25 : vector<1x32xf32>
      %28 = arith.divf %26, %27 : vector<1x32xf32>
      %29 = vector.shape_cast %28 : vector<1x32xf32> to vector<1x1x32xf32>
      %c0_27 = arith.constant 0 : index
      %c0_28 = arith.constant 0 : index
      %c0_29 = arith.constant 0 : index
      %30 = vector.load %arg7[%c0_27, %c0_28, %c0_29] : memref<1x1x32xf32, #tpu.memory_space<vmem>>, vector<1x1x32xf32>
      tpu.vector_store %arg7[%c0_27, %c0_28, %c0_29], %29 {strides = array<i32>} : memref<1x1x32xf32, #tpu.memory_space<vmem>>, vector<1x1x32xf32>,
    } else {
    }
    return
  }
  func.func @transform_0(%arg0: i32, %arg1: i32) -> (i32, i32, i32) {
    %c0_i32 = arith.constant 0 : i32
    %c0_i32_0 = arith.constant 0 : i32
    return %arg0, %c0_i32, %arg1 : i32, i32, i32
  }
  func.func @transform_1(%arg0: i32, %arg1: i32) -> (i32, i32) {
    %c0_i32 = arith.constant 0 : i32
    %c0_i32_0 = arith.constant 0 : i32
    %c0_i32_1 = arith.constant 0 : i32
    return %c0_i32, %c0_i32_0 : i32, i32
  }
  func.func @transform_2(%arg0: i32, %arg1: i32) -> (i32, i32) {
    %c0_i32 = arith.constant 0 : i32
    %c0_i32_0 = arith.constant 0 : i32
    %c0_i32_1 = arith.constant 0 : i32
    return %c0_i32, %c0_i32_0 : i32, i32
  }
  func.func @transform_3(%arg0: i32, %arg1: i32) -> (i32, i32) {
    %c0_i32 = arith.constant 0 : i32
    %c0_i32_0 = arith.constant 0 : i32
    %c0_i32_1 = arith.constant 0 : i32
    return %c0_i32, %c0_i32_0 : i32, i32
  }
  func.func @transform_4(%arg0: i32, %arg1: i32) -> (i32, i32) {
    %c0_i32 = arith.constant 0 : i32
    %c0_i32_0 = arith.constant 0 : i32
    %c0_i32_1 = arith.constant 0 : i32
    return %c0_i32, %c0_i32_0 : i32, i32
  }
  func.func @transform_5(%arg0: i32, %arg1: i32) -> (i32, i32, i32) {
    %c0_i32 = arith.constant 0 : i32
    %c0_i32_0 = arith.constant 0 : i32
    %c0_i32_1 = arith.constant 0 : i32
    return %arg0, %c0_i32, %c0_i32_0 : i32, i32, i32
  }
}

</mosaic_0001>

<bundles_post_ra>
// kernel: tpu_custom_call.1
= control target key start
LH: loop header
LB: loop body
LE: loop exit
PB: predicated region body
PF: predicated region fallthrough
CT: control target
= control target key end

     0   :  { %10 = vsyncpa [#allocation4], 0  ;;  %s893_s0 = inlined_call_operand.hbm [shape: f32[2,32,256], index: 0, kind: input, shape index: {}]   ;;  %s894_s1 = inlined_call_operand.vmem [shape: f32[32,2], index: 1, kind: input, shape index: {}]   ;;  %s895_s2 = inlined_call_operand.vmem [shape: f32[1,2], index: 2, kind: input, shape index: {}]   ;;  %s896_s3 = inlined_call_operand.vmem [shape: f32[2,32], index: 3, kind: input, shape index: {}]   ;;  %s897_s4 = inlined_call_operand.vmem [shape: f32[1,32], index: 4, kind: input, shape index: {}]   ;;  %s898_s5 = inlined_call_operand.hbm [shape: f32[2,1,32], index: 5, kind: output, shape index: {}]  }
   0x1   :  { %12 = vsyncpa [#allocation4 + $0x1], 0 }
   0x2   :  { %13 = vsyncpa [#allocation5], 0 }
   0x3   :  { %15 = vsyncpa [#allocation5 + $0x1], 0  ;;  %s751_s18 = smov 0   ;;  %s753_s19 = smov 0  }
   0x4   :  { %s755_s20 = smov 0   ;;  %s757_s21 = smov 0  }
   0x5   :  { %s759_s22 = smov 0   ;;  %s761_s23 = smov 0  }
   0x6 LB: > { %s521_s24 = sadd.s32 4294967295, %s717_s23   ;;  %s522_s25 = sadd.s32 4294967294, %s717_s23   ;;  %s717_s23 = sphi %s761_s23, %s21_s23   ;;  %s713_s22 = sphi %s759_s22, %s907_s22   ;;  %s709_s21 = sphi %s757_s21, %s906_s21   ;;  %s705_s20 = sphi %s755_s20, %s905_s20   ;;  %s701_s19 = sphi %s753_s19, %s904_s19   ;;  %s697_s18 = sphi %s751_s18, %s903_s18  }
   0x7   : > { %s33_s26 = sadd.s32 1, %s713_s22  ;;  %s42_s27 = sadd.s32 1, %s705_s20 }
   0x8   : > { %p35_p0 = scmp.ge.s32.totalorder %s33_s26, 2  ;;  %p49_p1 = scmp.ne.s32.totalorder %s705_s20, %s701_s19 }
   0x9   : > { %p50_p2 = scmp.eq.s32.totalorder %s717_s23, 0  ;;  %p55_p3 = scmp.ne.s32.totalorder %s701_s19, %s697_s18 }
   0xa   : > { %s909_s26 = smov (%p35_p0, %s33_s26), 0  ;;  %p56_p5 = scmp.eq.s32.totalorder %s521_s24, 0 }
   0xb   : > { %p792_p4 = por %p50_p2, %p49_p1  ;;  %s37_s29 = ssub.s32 %s713_s22, %s909_s26 }
   0xc   : > { %p163_p6 = scmp.eq.s32.totalorder %s521_s24, 1  ;;  %p40_p7 = scmp.eq.s32.totalorder %s37_s29, 0 }
   0xd   : > { %p798_p8 = por %p56_p5, %p55_p3  ;;  %p169_p10 = scmp.eq.s32.totalorder %s522_s25, 1 }
   0xe   : > { %p802_p9 = por %p163_p6, %p49_p1  ;;  %p524_p12 = scmp.ge.s32.totalorder %s717_s23, 2 }
   0xf   : > { %s807_s7 = scalar_select %p40_p7, %s705_s20, %s42_s27  }
  0x10   : > { %p809_p11 = por %p169_p10, %p55_p3  ;;  %p549_p13 = scmp.lt.s32.totalorder %s717_s23, 2 }
  0x11   : > { %s201_s9 = sand.u32 1, %s705_s20   ;;  %s536_s11 = sshll.u32 %s713_s22, 6 }
  0x12   : > { %s525_s10 = sshll.u32 %s201_s9, 6  ;;  %s212_s14 = scalar_lea.hbm %s893_s0, %s536_s11 }
  0x13   : > { %s205_s15 = scalar_lea.vmem [#allocation3], %s525_s10  ;;  %s213_s17 = sshll.u32 %s212_s14, 4  ;;  %s214_s17 = int_to_ptr.hbm [resolvable:$true] %s213_s17 }
  0x14   : > { %s215_s16 = sshll.u32 %s205_s15, 4  ;;  %p542_p0 = pnand %p549_p13, %p792_p4  ;;  %s216_s16 = int_to_ptr.vmem [resolvable:$true] %s215_s16 }
  0x15   : > { %p528_p1 = scmp.ge.s32.totalorder %s717_s23, 1  ;;  %s202_s24 = scalar_lea.sflag [#allocation4], %s201_s9 }
  0x16   : > { %s719_s25 = smov 256   ;;  %s720_s27 = smov 16  }
  0x17   : > { %544 = dma.hbm_to_vmem [thread:$0]  (!%p542_p0), %s214_s17, 1024, %s216_s16, %s202_s24, %s719_s25, %s719_s25, %s720_s27  }
  0x18   : > { %p223_p2 = scmp.lt.s32.totalorder %s717_s23, 3 }
  0x1a   : > { %p224_p3 = pnand %p528_p1, %p223_p2 }
  0x1b   : > { %s825_s29 = sand.u32 (!%p224_p3), 1, %s701_s19  }
  0x1c   : > { %227 = sbr.rel (%p224_p3) target bundleno = 457 (0x1c9), region = 40  ;;  %s529_s10 = sshll.u32 (!%p224_p3), %s825_s29, 6 }
  0x1d   : > { %s230_s11 = scalar_lea.sflag (!%p224_p3), [#allocation4], %s825_s29  ;;  %s233_s12 = scalar_lea.vmem (!%p224_p3), [#allocation3], %s529_s10 }
  0x21   : > { %688 = dma.done.wait (%p798_p8), %s230_s11, 1024  }
  0x22   : > { %690 = vsyncadd (%p798_p8), %s230_s11, 4294966272  ;;  %v273_v0 = vld [vmem:[%s233_s12] sm:$0xff]  ;;  %v274_v1 = vld [vmem:[%s233_s12 + $0x8] sm:$0xff]  ;;  %v341_v16 = vlaneseq  ;;  %vm346_vm0 = vcmask 130112   ;;  %vm350_vm1 = vcmask 195712   ;;  %vm354_vm2 = vcmask 261312   ;;  %s440_s30 = scalar_lea.hbm %s898_s5, %s709_s21 }
  0x23   : > { %v277_v2 = vld [vmem:[%s233_s12 + $0x20] sm:$0xff]  ;;  %v316_v3 = vadd.f32 %v274_v1, %v273_v0  ;;  %v278_v4 = vld [vmem:[%s233_s12 + $0x28] sm:$0xff]  ;;  %v275_v6 = vld [vmem:[%s233_s12 + $0x10] sm:$0xff]  ;;  %vm356_vm3 = vcmask 261120   ;;  %vm386_vm4 = vcmask 1041408   ;;  %vm382_vm5 = vcmask 15360  }
  0x24   : > { %v322_v5 = vadd.f32 %v278_v4, %v277_v2  ;;  %v276_v7 = vld [vmem:[%s233_s12 + $0x18] sm:$0xff]  ;;  %v279_v8 = vld [vmem:[%s233_s12 + $0x30] sm:$0xff]  ;;  %v333_v14 = vld [vmem:[%s894_s1 + $0x8] sm:$0xff]  ;;  %v342_v19 = vand.u32 127, %v341_v16  ;;  %s259_s13 = scalar_lea.vmem [#allocation6], %s825_s29  ;;  %s444_s15 = sshll.u32 %s440_s30, 4  ;;  %s445_s15 = int_to_ptr.hbm [resolvable:$true] %s444_s15 }
  0x25   : > { %317 = vadd.xlane.f32.xlu0 %v316_v3  ;;  %v280_v9 = vld [vmem:[%s233_s12 + $0x38] sm:$0xff]  ;;  %v319_v10 = vadd.f32 %v276_v7, %v275_v6  ;;  %v334_v13 = vld [vmem:[%s894_s1 + $0x10] sm:$0xff]  ;;  %v332_v15 = vld [vmem:[%s894_s1] sm:$0xff]  ;;  %s442_s14 = sshll.u32 %s259_s13, 4  ;;  %vm429_vm9 = vcmask 253952   ;;  %s432_s21 = scalar_lea.sflag [#allocation5], %s825_s29  ;;  %s443_s14 = int_to_ptr.vmem [resolvable:$true] %s442_s14 }
  0x26   : > { %323 = vadd.xlane.f32.xlu1 %v322_v5  ;;  %v325_v11 = vadd.f32 %v280_v9, %v279_v8  ;;  %v335_v12 = vld [vmem:[%s894_s1 + $0x18] sm:$0xff]  ;;  %v344_v21 = vadd.s32 4294967288, %v342_v19  ;;  %v348_v22 = vadd.s32 4294967280, %v342_v19  ;;  %v352_v25 = vadd.s32 4294967272, %v342_v19  ;;  %v380_v36 = vld [vmem:[%s896_s3] sm:$0x3] }
  0x27   : > { %371 = vmatpush.msra.mxu0 %v335_v12  ;;  %531 = vmatpush.msk.msra.mxu1 %vm386_vm4, %v380_v36  ;;  %v336_v37 = vld [vmem:[%s895_s2] sm:$0x1]  ;;  %s649_s16 = sshra.s32 %s445_s15, 4  ;;  %s655_s27 = scalar_lea.hbm %s898_s5, 2  ;;  %s650_s16 = int_to_ptr.hbm [resolvable:$true] %s649_s16 }
  0x28   : > { %v381_v41 = vld [vmem:[%s897_s4] sm:$0x1]  ;;  %s651_s17 = scalar_lea.hbm %s650_s16, 1  ;;  %p656_p7 = scmp.lt.s32.totalorder %s650_s16, %s898_s5 }
  0x29   : > { %372 = vmatpush.msra.mxu0 %v334_v13  ;;  %p652_p4 = scmp.ne.s32.totalorder %s650_s16, %s651_s17  ;;  %p657_p8 = scmp.lt.s32.totalorder %s655_s27, %s651_s17 }
  0x2b   : > { %373 = vmatpush.msra.mxu0 %v333_v14  ;;  %p653_p5 = pnand %p652_p4, %p802_p9  ;;  %p658_p10 = por %p657_p8, %p656_p7 }
  0x2d   : > { %320 = vadd.xlane.f32.xlu0 %v319_v10  ;;  %374 = vmatpush.msra.mxu0 %v332_v15  ;;  %p654_p6 = pneg %p653_p5 }
  0x2e   : > { %326 = vadd.xlane.f32.xlu1 %v325_v11 }
  0x2f   : > { %p659_p13 = pnand %p658_p10, %p654_p6 }
  0x98   : > { %v318_v17 = vpop.xlane.xlu0 %317 }
  0x99   : > { %v324_v18 = vpop.xlane.xlu1 %323  ;;  %v328_v20 = vmul.f32 0.00390625, %v318_v17 }
  0x9a   : > { %v330_v23 = vmul.f32 0.00390625, %v324_v18 }
  0x9b   : > { %v343_v29 = vperm.slane %v328_v20, %v342_v19 }
  0x9c   : > { %v349_v31 = vperm.slane %v330_v23, %v348_v22 }
  0xa0   : > { %v321_v24 = vpop.xlane.xlu0 %320 }
  0xa1   : > { %v329_v26 = vmul.f32 0.00390625, %v321_v24  ;;  %v327_v27 = vpop.xlane.xlu1 %326 }
  0xa2   : > { %v331_v28 = vmul.f32 0.00390625, %v327_v27 }
  0xa3   : > { %v345_v30 = vperm.slane %v329_v26, %v344_v21 }
  0xa4   : > { %v353_v32 = vperm.slane %v331_v28, %v352_v25 }
  0xa5   : > { %v347_v33 = vsel %vm346_vm0, %v345_v30, %v343_v29 }
  0xa6   : > { %v351_v34 = vsel %vm350_vm1, %v349_v31, %v347_v33 }
  0xa7   : > { %v355_v35 = vsel %vm354_vm2, %v353_v32, %v351_v34 }
  0xa8   : > { %530 = vmatmul.msk.f32.vlgmr.msra.gmra.mxu0 %vm356_vm3, %v355_v35 }
 0x125   : > { %v376_v38 = vpop.f32.mrf.mxu0 }
 0x126   : > { %v377_v39 = vadd.f32 %v376_v38, %v336_v37 }
 0x128   : > { %v379_v40 = vmax.f32 %v377_v39, 0.0 }
 0x12a   : > { %532 = vmatmul.msk.f32.vlgmr.msra.gmra.mxu1 %vm382_vm5, %v379_v40 }
 0x1a7   : > { %v407_v42 = vpop.f32.mrf.mxu1 }
 0x1a8   : > { %v408_v43 = vadd.f32 %v407_v42, %v381_v41 }
 0x1aa   : > { %v533_v44 = vmul.f32 -1.442695, %v408_v43 }
 0x1ac   : > { %601 = vpow2.f32 %v533_v44 }
 0x1b2   : > { %v602_v45 = vpop.eup %601 }
 0x1b3   : > { %v413_v46 = vadd.f32 1.0, %v602_v45 }
 0x1b5   : > { %603 = vrcp.f32 %v413_v46  ;;  %v425_v50 = vand.u32 2147483648, %v413_v46  ;;  %v423_v52 = vand.u32 2147483647, %v413_v46  ;;  %vm419_vm7 = vweird.f32 %v413_v46 }
 0x1b7   : > { %v426_v54 = vor.u32 1.1754944e-38, %v425_v50  ;;  %vm424_vm10 = vcmp.eq.f32.partialorder %v423_v52, 8.507059e+37 }
 0x1bb   : > { %v604_v47 = vpop.eup %603 }
 0x1bc   : > { %v415_v48 = vmul.f32 %v604_v47, %v413_v46  ;;  %vm420_vm6 = vweird.f32 %v604_v47 }
 0x1bd   : > { %vm421_vm8 = vmor %vm419_vm7, %vm420_vm6 }
 0x1be   : > { %v416_v49 = vsub.f32 1.0, %v415_v48 }
 0x1c0   : > { %v417_v51 = vmul.f32 %v604_v47, %v416_v49 }
 0x1c2   : > { %v418_v53 = vadd.f32 %v604_v47, %v417_v51 }
 0x1c4   : > { %v422_v55 = vsel %vm421_vm8, %v604_v47, %v418_v53 }
 0x1c5   : > { %v427_v56 = vsel %vm424_vm10, %v426_v54, %v422_v55 }
 0x1c6   : > { %430 = vst.msk [vmem:[%s259_s13] sm:$0x1] %vm429_vm9, %v427_v56 }
 0x1c7   : > { %662 = shalt.err (!%p659_p13)
}
 0x1c8   : > { %539 = dma.vmem_to_hbm [thread:$0]  (%p802_p9), %s443_s14, 16, %s445_s15, %s432_s21  }
 0x1c9 PF: > { %s456_s29 = sand.u32 1, %s697_s18   ;;  %p546_p0 = pnand %p524_p12, %p809_p11 }
 0x1ca   : > { %s457_s12 = scalar_lea.sflag [#allocation5], %s456_s29 }
 0x1cb   : > { %p547_p1 = pneg %p546_p0 }
 0x1cd   : > { %692 = dma.done.wait (%p547_p1), %s457_s12, 16  }
 0x1ce   : > { %694 = vsyncadd (%p547_p1), %s457_s12, 4294967280  ;;  %s21_s23 = sadd.s32 1, %s717_s23   ;;  %s903_s18 = smov %s701_s19 }
 0x1cf   : > { %p18_p2 = scmp.ge.s32.totalorder %s21_s23, 4   ;;  %s904_s19 = smov %s705_s20 }
 0x1d0   : > { %s905_s20 = smov %s807_s7  ;;  %s906_s21 = smov %s713_s22 }
 0x1d1   : > { %s907_s22 = smov %s909_s26  ;;  %20 = sbr.rel (!%p18_p2) target bundleno = 6 (0x6), region = 93 }
 0x1d6   :  { %462 = vsyncpa [#allocation4], 1 }
 0x1d7   :  { %464 = vsyncpa [#allocation4 + $0x1], 1 }
 0x1d8   :  { %465 = vsyncpa [#allocation5], 1 }
 0x1d9   :  { %467 = vsyncpa [#allocation5 + $0x1], 1 }

</bundles_post_ra>
